<compile_context>
chip_gen: v7x
topology: tpu7x:2x2x1
jax: 0.10.0
libtpu: 0.0.40
codegen_flags: <defaults>
</compile_context>

<pallas_src>
import jax
import jax.numpy as jnp
from jax.experimental import pallas as pl
from jax.experimental.pallas import tpu as pltpu


def _round_up(x, m):
    return ((x + m - 1) // m) * m


def _pick_tile(size, max_tile, align):
    """Largest `align`-multiple tile <= max_tile with bounded padding waste.

    Returns (tile, padded_size) where padded_size is a multiple of tile and
    the zero-padding waste is either 0 or <= 12.5% of the aligned size.
    """
    size_a = _round_up(size, align)
    t = min(_round_up(max_tile, align), size_a)
    while t > align:
        waste = _round_up(size_a, t) - size_a
        if waste == 0 or waste * 8 <= size_a:
            break
        t = _round_up(t // 2, align)
    t = max(t, align)
    return t, _round_up(size_a, t)


def _default_max_tile():
    # 128 MiB-VMEM parts (v5e/v6e) can afford 1024-wide output tiles (v6e in
    # particular needs ~650 flops/byte to reach its MXU roofline); stay at 512
    # on 64 MiB parts (v7x). Falls back to 512 if the query is unavailable.
    try:
        vmem_bytes = pltpu.get_tpu_info().vmem_capacity_bytes
    except Exception:
        vmem_bytes = 64 * 1024 * 1024
    return 1024 if vmem_bytes >= 100 * 1024 * 1024 else 512


# ---------------------------------------------------------------------------
# Kernel 1: induced infinity norm of a matrix  ->  max_i sum_j |x[i, j]|
# Grid = (row tiles, D tiles); D innermost. Partial row abs-sums accumulate in
# a (tm, 1) VMEM scratch; the running global max lives in a (1, 1) scratch and
# is written out once at the very last grid step.
# ---------------------------------------------------------------------------
def _inf_norm_kernel(x_ref, o_ref, rowsum_ref, max_ref):
    i = pl.program_id(0)
    j = pl.program_id(1)

    @pl.when((i == 0) & (j == 0))
    def _():
        max_ref[...] = jnp.zeros_like(max_ref)      # row abs-sums are >= 0

    @pl.when(j == 0)
    def _():
        rowsum_ref[...] = jnp.zeros_like(rowsum_ref)

    rowsum_ref[...] += jnp.sum(jnp.abs(x_ref[...].astype(jnp.float32)),
                               axis=-1, keepdims=True)

    @pl.when(j == pl.num_programs(1) - 1)
    def _():
        tile_max = jnp.max(rowsum_ref[...], axis=0, keepdims=True)
        max_ref[...] = jnp.maximum(max_ref[...], tile_max)

    @pl.when((i == pl.num_programs(0) - 1) & (j == pl.num_programs(1) - 1))
    def _():
        o_ref[...] = max_ref[...]


def inf_norm(x, *, max_rows=512, max_cols=2048):
    n, d = x.shape
    row_align = {4: 8, 2: 16, 1: 32}.get(x.dtype.itemsize, 8)
    tm, n_p = _pick_tile(n, max_rows, row_align)
    td, d_p = _pick_tile(d, max_cols, 128)
    if (n_p, d_p) != (n, d):
        # Zero rows have |row|-sum 0 <= true max (>= 0); zero cols add 0. Safe.
        x = jnp.pad(x, ((0, n_p - n), (0, d_p - d)))
    return pl.pallas_call(
        _inf_norm_kernel,
        out_shape=jax.ShapeDtypeStruct((1, 1), jnp.float32),
        grid_spec=pltpu.PrefetchScalarGridSpec(
            num_scalar_prefetch=0,
            grid=(n_p // tm, d_p // td),
            in_specs=[pl.BlockSpec((tm, td), lambda i, j: (i, j))],
            out_specs=pl.BlockSpec((1, 1), lambda i, j: (0, 0)),
            scratch_shapes=[pltpu.VMEM((tm, 1), jnp.float32),
                            pltpu.VMEM((1, 1), jnp.float32)],
        ),
        compiler_params=pltpu.CompilerParams(
            dimension_semantics=("arbitrary", "arbitrary"),
            vmem_limit_bytes=32 * 1024 * 1024,
        ),
    )(x)


# ---------------------------------------------------------------------------
# Kernel 2: scaled Gram matrix  K = scale * x1 @ x2.T   (x2 pre-transposed)
#
# Fused-K variant (padded D <= max_fused_k): grid = (row tiles, col tiles),
# x1 row-band index is constant across j so it is DMA'd once; single-shot dot
# and a lane-dense f32 store. Scale lives in SMEM.
#
# K-tiled variant (large D): grid = (i, j, k) with k innermost ("arbitrary");
# the f32 output tile itself is the accumulator (zero at k==0, += dot, scale
# at k==last) -- no VMEM scratch.
# ---------------------------------------------------------------------------
def _gram_fused_kernel(scale_ref, x1_ref, x2t_ref, o_ref):
    o_ref[...] = (jnp.dot(x1_ref[...], x2t_ref[...],
                          preferred_element_type=jnp.float32)
                  * scale_ref[0]).astype(o_ref.dtype)


def _gram_ktiled_kernel(scale_ref, x1_ref, x2t_ref, o_ref):
    k = pl.program_id(2)

    @pl.when(k == 0)
    def _():
        o_ref[...] = jnp.zeros_like(o_ref)

    o_ref[...] += jnp.dot(x1_ref[...], x2t_ref[...],
                          preferred_element_type=jnp.float32)

    @pl.when(k == pl.num_programs(2) - 1)
    def _():
        o_ref[...] = o_ref[...] * scale_ref[0]


def scaled_gram(x1, x2, scale, *, use_bf16=True, max_tile=None,
                max_fused_k=2048, max_k_tile=512):
    n, d = x1.shape
    m, d2 = x2.shape
    assert d == d2, "feature dims must match"

    if max_tile is None:
        max_tile = _default_max_tile()

    in_dtype = jnp.bfloat16 if use_bf16 else jnp.float32
    elt = 2 if use_bf16 else 4
    row_align = 16 if use_bf16 else 8

    # Alignment-only padding: tiles shrink for small problems instead of the
    # problem being rounded up to big fixed tiles.
    tm, n_p = _pick_tile(n, max_tile, row_align)
    tn, m_p = _pick_tile(m, max_tile, 128)
    d_aligned = _round_up(d, 128)
    fused_k = d_aligned <= max_fused_k
    if fused_k:
        tk, d_p = d_aligned, d_aligned
    else:
        tk, d_p = _pick_tile(d, max_k_tile, 128)

    # Keep the double-buffered VMEM footprint bounded (v7x has 64 MiB total).
    def footprint(tm_, tn_, tk_):
        return 2 * (tm_ * tk_ + tk_ * tn_) * elt + 2 * tm_ * tn_ * 4

    budget = 28 * 1024 * 1024
    while footprint(tm, tn, tk) > budget:
        if tm >= tn and tm > row_align:
            tm = max(row_align, _round_up(tm // 2, row_align))
            n_p = _round_up(n, tm)
        elif tn > 128:
            tn = max(128, _round_up(tn // 2, 128))
            m_p = _round_up(m, tn)
        elif (not fused_k) and tk > 128:
            tk = max(128, _round_up(tk // 2, 128))
            d_p = _round_up(d, tk)
        else:
            break

    # Pad (zeros contribute 0 to the dot products) and cast to the streaming
    # dtype in the wrapper so HBM traffic is already narrow. Pre-transpose x2
    # to (D, M) so the kernel contraction needs no per-step transpose.
    x1p = jnp.pad(x1, ((0, n_p - n), (0, d_p - d))).astype(in_dtype)
    x2p = jnp.pad(x2, ((0, m_p - m), (0, d_p - d))).astype(in_dtype)
    x2t = x2p.T                                           # (d_p, m_p)

    scale_arr = jnp.asarray(scale, jnp.float32).reshape((1,))
    vmem_limit = min(48 * 1024 * 1024,
                     footprint(tm, tn, tk) + 16 * 1024 * 1024)

    if fused_k:
        out = pl.pallas_call(
            _gram_fused_kernel,
            out_shape=jax.ShapeDtypeStruct((n_p, m_p), jnp.float32),
            grid_spec=pltpu.PrefetchScalarGridSpec(
                num_scalar_prefetch=0,
                grid=(n_p // tm, m_p // tn),              # j innermost
                in_specs=[
                    pl.BlockSpec(memory_space=pltpu.MemorySpace.SMEM),  # scale
                    pl.BlockSpec((tm, d_p), lambda i, j: (i, 0)),  # x1 band, reused over j
                    pl.BlockSpec((d_p, tn), lambda i, j: (0, j)),  # x2t stream
                ],
                out_specs=pl.BlockSpec((tm, tn), lambda i, j: (i, j)),
            ),
            compiler_params=pltpu.CompilerParams(
                dimension_semantics=("parallel", "arbitrary"),
                vmem_limit_bytes=vmem_limit,
            ),
        )(scale_arr, x1p, x2t)
    else:
        out = pl.pallas_call(
            _gram_ktiled_kernel,
            out_shape=jax.ShapeDtypeStruct((n_p, m_p), jnp.float32),
            grid_spec=pltpu.PrefetchScalarGridSpec(
                num_scalar_prefetch=0,
                grid=(n_p // tm, m_p // tn, d_p // tk),   # K axis last
                in_specs=[
                    pl.BlockSpec(memory_space=pltpu.MemorySpace.SMEM),  # scale
                    pl.BlockSpec((tm, tk), lambda i, j, k: (i, k)),
                    pl.BlockSpec((tk, tn), lambda i, j, k: (k, j)),
                ],
                out_specs=pl.BlockSpec((tm, tn), lambda i, j, k: (i, j)),
            ),
            compiler_params=pltpu.CompilerParams(
                dimension_semantics=("parallel", "parallel", "arbitrary"),
                vmem_limit_bytes=vmem_limit,
            ),
        )(scale_arr, x1p, x2t)
    return out[:n, :m]


# ---------------------------------------------------------------------------
# Python wrapper mirroring LinearKernel.forward(...) followed by .evaluate().
# ---------------------------------------------------------------------------
def linear_kernel_forward(x1, x2=None, nu=1.0, use_bf16=True, **gram_kwargs):
    n1 = inf_norm(x1)                        # (1, 1) f32, on the original dtype
    if x2 is None:
        divide = n1 * n1                     # ||x1||_inf ** 2
        x2_eval = x1
    else:
        divide = n1 * inf_norm(x2)           # ||x1||_inf * ||x2||_inf
        x2_eval = x2
    scale = jnp.float32(nu) / divide         # nu / divide, passed via SMEM
    return scaled_gram(x1, x2_eval, scale, use_bf16=use_bf16, **gram_kwargs)


# ---------------------------------------------------------------------------
# Pure-JAX reference for correctness checks.
# ---------------------------------------------------------------------------
def _reference(x1, x2=None, nu=1.0):
    def inf_n(x):
        return jnp.max(jnp.sum(jnp.abs(x), axis=-1))
    if x2 is None:
        divide = inf_n(x1) ** 2
        x2 = x1
    else:
        divide = inf_n(x1) * inf_n(x2)
    return nu * (x1 @ x2.T) / divide


if __name__ == "__main__":
    key = jax.random.PRNGKey(0)
    k1, k2, k3, k4 = jax.random.split(key, 4)

    # Small shapes: exercise padding / single-tile path.
    x1s = jax.random.normal(k1, (16, 32), dtype=jnp.float32)
    x2s = jax.random.normal(k2, (8, 32), dtype=jnp.float32)
    # Larger shapes: multi-row / multi-col tiles, fused-K path (D=640 <= 2048).
    x1l = jax.random.normal(k3, (300, 640), dtype=jnp.float32)
    x2l = jax.random.normal(k4, (130, 640), dtype=jnp.float32)

    cases = [(x1s, None, {}), (x1s, x2s, {}), (x1l, None, {}), (x1l, x2l, {}),
             # Force the K-tiled accumulator path on the same data.
             (x1l, x2l, {"max_fused_k": 256})]
    for a, b, kw in cases:
        ref = _reference(a, b, nu=1.0)
        out_bf16 = jax.block_until_ready(
            linear_kernel_forward(a, b, nu=1.0, use_bf16=True, **kw))
        out_f32 = jax.block_until_ready(
            linear_kernel_forward(a, b, nu=1.0, use_bf16=False, **kw))
        assert out_bf16.shape == ref.shape and out_f32.shape == ref.shape
        assert jnp.allclose(out_bf16, ref, rtol=3e-2, atol=2e-4), "bf16 path mismatch"
        assert jnp.allclose(out_f32, ref, rtol=1e-3, atol=1e-5), "f32 path mismatch"

    print("KERNEL_OK")
</pallas_src>

<mosaic_0001>
module attributes {stable_mosaic.version = 11 : i64} {
  func.func @_inf_norm_kernel(%arg0: i32, %arg1: i32, %arg2: memref<16x128xf32, #tpu.memory_space<vmem>>, %arg3: memref<1x1xf32, #tpu.memory_space<vmem>>, %arg4: memref<16x1xf32, #tpu.memory_space<vmem>>, %arg5: memref<1x1xf32, #tpu.memory_space<vmem>>) attributes {dimension_semantics = [#tpu.dimension_semantics<arbitrary>, #tpu.dimension_semantics<arbitrary>], iteration_bounds = array<i64: 1, 1>, scalar_prefetch = 0 : i64, scratch_operands = 2 : i64, tpu.core_type = #tpu.core_type<tc>, window_params = [{transform_indices = @transform_0, window_bounds = array<i64: 16, 128>}, {pipeline_mode = #tpu.pipeline_mode<synchronous>, transform_indices = @transform_1, window_bounds = array<i64: 1, 1>}]} {
    %c0_i32 = arith.constant 0 : i32
    %0 = arith.cmpi eq, %arg0, %c0_i32 : i32
    %c0_i32_0 = arith.constant 0 : i32
    %1 = arith.cmpi eq, %arg1, %c0_i32_0 : i32
    %2 = arith.andi %0, %1 : i1
    %3 = arith.extui %2 : i1 to i32
    %c0_i32_1 = arith.constant 0 : i32
    %4 = arith.cmpi ne, %3, %c0_i32_1 : i32
    scf.if %4 {
      %cst_14 = arith.constant 0.000000e+00 : f32
      %23 = vector.broadcast %cst_14 : f32 to vector<1x1xf32>
      %c0_15 = arith.constant 0 : index
      %c0_16 = arith.constant 0 : index
      %24 = vector.load %arg5[%c0_15, %c0_16] : memref<1x1xf32, #tpu.memory_space<vmem>>, vector<1x1xf32>
      tpu.vector_store %arg5[%c0_15, %c0_16], %23 {strides = array<i32>} : memref<1x1xf32, #tpu.memory_space<vmem>>, vector<1x1xf32>,
    } else {
    }
    %c0_i32_2 = arith.constant 0 : i32
    %5 = arith.cmpi eq, %arg1, %c0_i32_2 : i32
    %6 = arith.extui %5 : i1 to i32
    %c0_i32_3 = arith.constant 0 : i32
    %7 = arith.cmpi ne, %6, %c0_i32_3 : i32
    scf.if %7 {
      %cst_14 = arith.constant 0.000000e+00 : f32
      %23 = vector.broadcast %cst_14 : f32 to vector<16x1xf32>
      %c0_15 = arith.constant 0 : index
      %c0_16 = arith.constant 0 : index
      %24 = vector.load %arg4[%c0_15, %c0_16] : memref<16x1xf32, #tpu.memory_space<vmem>>, vector<16x1xf32>
      tpu.vector_store %arg4[%c0_15, %c0_16], %23 {strides = array<i32>} : memref<16x1xf32, #tpu.memory_space<vmem>>, vector<16x1xf32>,
    } else {
    }
    %c0 = arith.constant 0 : index
    %c0_4 = arith.constant 0 : index
    %8 = vector.load %arg4[%c0, %c0_4] : memref<16x1xf32, #tpu.memory_space<vmem>>, vector<16x1xf32>
    %c0_5 = arith.constant 0 : index
    %c0_6 = arith.constant 0 : index
    %9 = vector.load %arg2[%c0_5, %c0_6] : memref<16x128xf32, #tpu.memory_space<vmem>>, vector<16x128xf32>
    %10 = math.absf %9 : vector<16x128xf32>
    %cst = arith.constant dense<0.000000e+00> : vector<16xf32>
    %11 = vector.multi_reduction <add>, %10, %cst [1] : vector<16x128xf32> to vector<16xf32>
    %12 = vector.shape_cast %11 : vector<16xf32> to vector<16x1xf32>
    %13 = arith.addf %8, %12 : vector<16x1xf32>
    %c0_7 = arith.constant 0 : index
    %c0_8 = arith.constant 0 : index
    %14 = vector.load %arg4[%c0_7, %c0_8] : memref<16x1xf32, #tpu.memory_space<vmem>>, vector<16x1xf32>
    tpu.vector_store %arg4[%c0_7, %c0_8], %13 {strides = array<i32>} : memref<16x1xf32, #tpu.memory_space<vmem>>, vector<16x1xf32>,
    %c0_i32_9 = arith.constant 0 : i32
    %15 = arith.cmpi eq, %arg1, %c0_i32_9 : i32
    %16 = arith.extui %15 : i1 to i32
    %c0_i32_10 = arith.constant 0 : i32
    %17 = arith.cmpi ne, %16, %c0_i32_10 : i32
    scf.if %17 {
      %c0_14 = arith.constant 0 : index
      %c0_15 = arith.constant 0 : index
      %23 = vector.load %arg4[%c0_14, %c0_15] : memref<16x1xf32, #tpu.memory_space<vmem>>, vector<16x1xf32>
      %cst_16 = arith.constant dense<0xFF800000> : vector<1xf32>
      %24 = vector.multi_reduction <maximumf>, %23, %cst_16 [0] : vector<16x1xf32> to vector<1xf32>
      %25 = vector.shape_cast %24 : vector<1xf32> to vector<1x1xf32>
      %c0_17 = arith.constant 0 : index
      %c0_18 = arith.constant 0 : index
      %26 = vector.load %arg5[%c0_17, %c0_18] : memref<1x1xf32, #tpu.memory_space<vmem>>, vector<1x1xf32>
      %27 = arith.maximumf %26, %25 : vector<1x1xf32>
      %c0_19 = arith.constant 0 : index
      %c0_20 = arith.constant 0 : index
      %28 = vector.load %arg5[%c0_19, %c0_20] : memref<1x1xf32, #tpu.memory_space<vmem>>, vector<1x1xf32>
      tpu.vector_store %arg5[%c0_19, %c0_20], %27 {strides = array<i32>} : memref<1x1xf32, #tpu.memory_space<vmem>>, vector<1x1xf32>,
    } else {
    }
    %c0_i32_11 = arith.constant 0 : i32
    %18 = arith.cmpi eq, %arg0, %c0_i32_11 : i32
    %c0_i32_12 = arith.constant 0 : i32
    %19 = arith.cmpi eq, %arg1, %c0_i32_12 : i32
    %20 = arith.andi %18, %19 : i1
    %21 = arith.extui %20 : i1 to i32
    %c0_i32_13 = arith.constant 0 : i32
    %22 = arith.cmpi ne, %21, %c0_i32_13 : i32
    scf.if %22 {
      %c0_14 = arith.constant 0 : index
      %c0_15 = arith.constant 0 : index
      %23 = vector.load %arg5[%c0_14, %c0_15] : memref<1x1xf32, #tpu.memory_space<vmem>>, vector<1x1xf32>
      %c0_16 = arith.constant 0 : index
      %c0_17 = arith.constant 0 : index
      %24 = vector.load %arg3[%c0_16, %c0_17] : memref<1x1xf32, #tpu.memory_space<vmem>>, vector<1x1xf32>
      tpu.vector_store %arg3[%c0_16, %c0_17], %23 {strides = array<i32>} : memref<1x1xf32, #tpu.memory_space<vmem>>, vector<1x1xf32>,
    } else {
    }
    return
  }
  func.func @transform_0(%arg0: i32, %arg1: i32) -> (i32, i32) {
    %c0_i32 = arith.constant 0 : i32
    return %arg0, %arg1 : i32, i32
  }
  func.func @transform_1(%arg0: i32, %arg1: i32) -> (i32, i32) {
    %c0_i32 = arith.constant 0 : i32
    %c0_i32_0 = arith.constant 0 : i32
    %c0_i32_1 = arith.constant 0 : i32
    return %c0_i32, %c0_i32_0 : i32, i32
  }
}

</mosaic_0001>

<bundles_post_ra>
// kernel: tpu_custom_call.1
= control target key start
LH: loop header
LB: loop body
LE: loop exit
PB: predicated region body
PF: predicated region fallthrough
CT: control target
= control target key end

     0   :  { %6 = vsyncpa [#allocation5], 0  ;;  %s191_s0 = inlined_call_operand.hbm [shape: f32[16,128], index: 0, kind: input, shape index: {}]   ;;  %s192_s1 = inlined_call_operand.hbm [shape: f32[1,1], index: 1, kind: output, shape index: {}]  }
   0x1   :  { %7 = vsyncpa [#allocation6], 0  ;;  %s143_s6 = smov [#allocation4]   ;;  %s95_s10 = scalar_lea.hbm %s191_s0, 256 }
   0x2   :  { %s13_s7 = sshll.u32 %s143_s6, 4  ;;  %p96_p0 = scmp.ne.s32.totalorder %s191_s0, %s95_s10  ;;  %s14_s7 = int_to_ptr.vmem [resolvable:$true] %s13_s7 }
   0x3   :  { %p99_p1 = scmp.lt.u32.totalorder %s95_s10, %s191_s0 }
   0x5   :  { %p101_p2 = pnand %p99_p1, %p96_p0 }
   0x7   :  { %104 = shalt.err (!%p101_p2)
}
   0x8   :  { %s105_s15 = scalar_lea.vmem %s14_s7, 256  ;;  %p110_p4 = scmp.lt.s32.totalorder %s14_s7, %s14_s7 }
   0x9   :  { %p106_p3 = scmp.ne.s32.totalorder %s14_s7, %s105_s15  ;;  %p111_p5 = scmp.lt.s32.totalorder %s105_s15, %s105_s15 }
   0xb   :  { %p112_p6 = por %p111_p5, %p110_p4 }
   0xd   :  { %p113_p7 = pnand %p112_p6, %p106_p3 }
   0xf   :  { %116 = shalt.err (!%p113_p7)
}
  0x10   :  { %s144_s16 = smov 128   ;;  %s145_s17 = smov 8  }
  0x11   :  { %19 = dma.hbm_to_vmem [thread:$0]  %s191_s0, 256, %s14_s7, [#allocation5], %s144_s16, %s144_s16, %s145_s17  }
  0x12   :  { %139 = dma.done.wait [#allocation5], 256  }
  0x13   :  { %140 = vsyncadd [#allocation5], 4294967040  ;;  %vm34_vm0 = vcmask 7168   ;;  %v146_v0 = vmov 0.0   ;;  %v39_v1 = vld [vmem:[#allocation4] sm:$0xff]  ;;  %v40_v2 = vld [vmem:[#allocation4 + $0x8] sm:$0xff] }
  0x14   :  { %35 = vst.msk [vmem:[#allocation2] sm:$0xff] %vm34_vm0, %v146_v0  ;;  %36 = vst.msk [vmem:[#allocation2 + $0x8] sm:$0xff] %vm34_vm0, %v146_v0  ;;  %v41_v3 = vand.u32 2147483647, %v39_v1  ;;  %v42_v4 = vand.u32 2147483647, %v40_v2 }
  0x15   :  { %vm29_vm1 = vcmask 0   ;;  %s147_s0 = smov [#allocation7]  }
  0x16   :  { %43 = vadd.xlane.f32.xlu0 %v41_v3  ;;  %30 = vst.msk [vmem:[#allocation3] sm:$0x1] %vm29_vm1, %v146_v0  ;;  %s81_s20 = sshll.u32 %s147_s0, 4  ;;  %s82_s20 = int_to_ptr.vmem [resolvable:$true] %s81_s20 }
  0x17   :  { %s117_s21 = scalar_lea.vmem %s82_s20, 16  ;;  %s121_s22 = scalar_lea.vmem %s82_s20, 32 }
  0x18   :  { %p118_p8 = scmp.ne.s32.totalorder %s82_s20, %s117_s21  ;;  %p122_p9 = scmp.lt.s32.totalorder %s82_s20, %s82_s20 }
  0x19   :  { %p123_p10 = scmp.lt.s32.totalorder %s121_s22, %s117_s21 }
  0x1a   :  { %45 = vadd.xlane.f32.xlu0 %v42_v4 }
  0x1b   :  { %v37_v5 = vld [vmem:[#allocation2] sm:$0xff]  ;;  %v38_v8 = vld [vmem:[#allocation2 + $0x8] sm:$0xff]  ;;  %p124_p11 = por %p123_p10, %p122_p9 }
  0x1d   :  { %v66_v21 = vld [vmem:[#allocation3] sm:$0x1]  ;;  %p125_p12 = pnand %p124_p11, %p118_p8 }
  0xa3   :  { %v44_v6 = vpop.xlane.xlu0 %43 }
  0xa4   :  { %v47_v7 = vadd.f32 %v44_v6, %v37_v5 }
  0xa6   :  { %50 = vst.msk [vmem:[#allocation2] sm:$0xff] %vm34_vm0, %v47_v7 }
  0xa7   :  { %v46_v9 = vpop.xlane.xlu0 %45 }
  0xa8   :  { %v48_v10 = vadd.f32 %v46_v9, %v38_v8 }
  0xaa   :  { %51 = vst.msk [vmem:[#allocation2 + $0x8] sm:$0xff] %vm34_vm0, %v48_v10 }
  0xad   :  { %v55_v11 = vld [vmem:[#allocation2] sm:$0xff] }
  0xae   :  { %v57_v13 = vsel %vm34_vm0, %v55_v11, -inf }
  0xb1   :  { %v56_v12 = vld [vmem:[#allocation2 + $0x8] sm:$0xff] }
  0xb2   :  { %v58_v14 = vsel %vm34_vm0, %v56_v12, -inf }
  0xb3   :  { %v59_v15 = vmax.f32 %v57_v13, %v58_v14 }
  0xb5   :  { %v60_v16 = vrot.slane %v59_v15, 4 }
  0xb7   :  { %v61_v17 = vmax.f32 %v59_v15, %v60_v16 }
  0xb9   :  { %v62_v18 = vrot.slane %v61_v17, 2 }
  0xbb   :  { %v63_v19 = vmax.f32 %v61_v17, %v62_v18 }
  0xbd   :  { %v64_v20 = vrot.slane %v63_v19, 1 }
  0xbf   :  { %v65_v22 = vmax.f32 %v63_v19, %v64_v20 }
  0xc1   :  { %v67_v23 = vmax.f32 %v66_v21, %v65_v22 }
  0xc3   :  { %69 = vst.msk [vmem:[#allocation3] sm:$0x1] %vm29_vm1, %v67_v23 }
  0xca   :  { %v72_v24 = vld [vmem:[#allocation3] sm:$0x1] }
  0xcb   :  { %74 = vst.msk [vmem:[#allocation7] sm:$0x1] %vm29_vm1, %v72_v24 }
  0xcc   :  { %128 = shalt.err (!%p125_p12)
}
  0xcd   :  { %s129_s25 = scalar_lea.hbm %s192_s1, 16 }
  0xce   :  { %p130_p13 = scmp.ne.s32.totalorder %s192_s1, %s129_s25  ;;  %p133_p0 = scmp.lt.u32.totalorder %s129_s25, %s192_s1 }
  0xd0   :  { %p135_p1 = pnand %p133_p0, %p130_p13 }
  0xd2   :  { %138 = shalt.err (!%p135_p1)
}
  0xd3   :  { %84 = dma.vmem_to_hbm [thread:$0]  %s82_s20, 16, %s192_s1, [#allocation6]  }
  0xd4   :  { %141 = dma.done.wait [#allocation6], 16  }
  0xd5   :  { %142 = vsyncadd [#allocation6], 4294967280 }
  0xd6   :  { %88 = vsyncpa [#allocation5], 1 }
  0xd7   :  { %89 = vsyncpa [#allocation6], 1 }

</bundles_post_ra>
